<compile_context>
chip_gen: v7x
topology: tpu7x:2x2x1
jax: 0.10.0
libtpu: 0.0.40
codegen_flags: <defaults>
</compile_context>

<pallas_src>
import jax
import jax.numpy as jnp
from jax.experimental import pallas as pl
from jax.experimental.pallas import tpu as pltpu


def _simpled_kernel(x_ref, c_ref,
                    w_ed_ref, b_ed_ref,
                    w_ec_ref, b_ec_ref,
                    w1a_ref, w1b_ref, b1_ref,
                    w2_ref, b2_ref,
                    w3_ref, b3_ref,
                    out_ref):
    f32 = jnp.float32
    x = x_ref[...]                                  # [1, TB]  (batch on lanes)
    c = c_ref[...]                                  # [1, TB]

    # Linear(1, 10): rank-1, so VPU broadcast multiply-add (no K=1 MXU matmul).
    ex = w_ed_ref[...] * x + b_ed_ref[...]          # [10, TB]
    ec = w_ec_ref[...] * c + b_ec_ref[...]          # [10, TB]

    # concat([ex, ec]) followed by Linear(20, 30) as a split matmul (weights are [out, in]):
    #   W1 @ concat == W1[:, :10] @ ex + W1[:, 10:] @ ec
    h = (jnp.dot(w1a_ref[...], ex, preferred_element_type=f32)
         + jnp.dot(w1b_ref[...], ec, preferred_element_type=f32)
         + b1_ref[...])                             # [30, TB]
    h = jnp.where(h > 0, h, 0.1 * h)                # LeakyReLU(0.1)

    h = jnp.dot(w2_ref[...], h, preferred_element_type=f32) + b2_ref[...]   # [30, TB]
    h = jnp.where(h > 0, h, 0.1 * h)                # LeakyReLU(0.1)

    # Linear(30, 1): N=1 output -> per-lane weighted sum over the 30 hidden rows (stays lane-dense).
    o = jnp.sum(w3_ref[...] * h, axis=0, keepdims=True) + b3_ref[...]       # [1, TB]
    out_ref[...] = 1.0 / (1.0 + jnp.exp(-o))        # Sigmoid (exp -> EUP)


def simpled_forward(x, condition, params, *, batch_tile=2048):
    """x: [B, 1] f32, condition: [B, 1] f32 -> [B, 1] f32."""
    B = x.shape[0]
    (w_ed, b_ed, w_ec, b_ec, w1, b1, w2, b2, w3, b3) = params

    # Batch-on-lanes: pad batch up to a lane-aligned tile multiple.
    lane = 128
    b_lane = pl.cdiv(B, lane) * lane
    tb = min(batch_tile, b_lane)
    b_pad = pl.cdiv(b_lane, tb) * tb
    grid = (b_pad // tb,)

    xt = jnp.zeros((1, b_pad), jnp.float32).at[:, :B].set(x.reshape(1, B))
    ct = jnp.zeros((1, b_pad), jnp.float32).at[:, :B].set(condition.reshape(1, B))

    # Re-orient weights to [out, in] (PyTorch layout) for the act-on-lanes matmuls;
    # biases become [out, 1] columns that broadcast over lanes.
    param_arrays = (
        w_ed.reshape(10, 1), b_ed.reshape(10, 1),       # ebd_data
        w_ec.reshape(10, 1), b_ec.reshape(10, 1),       # ebd_condition
        w1[:10, :].T, w1[10:, :].T, b1.reshape(30, 1),  # net[0] split for concat-free matmul
        w2.T, b2.reshape(30, 1),                        # net[2]
        w3.reshape(30, 1), b3.reshape(1, 1),            # net[4]
    )

    batch_spec = pl.BlockSpec((1, tb), lambda i: (0, i))
    const_specs = [pl.BlockSpec(p.shape, lambda i: (0, 0)) for p in param_arrays]

    cost = pl.CostEstimate(
        flops=3100 * b_pad,                # ~2*(2*10 + 20*30 + 30*30 + 30) per element
        transcendentals=b_pad,             # one exp per element
        bytes_accessed=12 * b_pad + sum(int(p.size) * 4 for p in param_arrays),
    )

    out = pl.pallas_call(
        _simpled_kernel,
        grid=grid,
        in_specs=[batch_spec, batch_spec] + const_specs,
        out_specs=pl.BlockSpec((1, tb), lambda i: (0, i)),
        out_shape=jax.ShapeDtypeStruct((1, b_pad), jnp.float32),
        compiler_params=pltpu.CompilerParams(dimension_semantics=("parallel",)),
        cost_estimate=cost,
    )(xt, ct, *param_arrays)

    return out[0, :B].reshape(B, 1)


def init_params(key):
    """Deterministic init mimicking nn.Linear default (uniform +/- 1/sqrt(fan_in)).
    Weights kept in [in, out] orientation (reference does x @ w)."""
    def linear(k, fan_in, fan_out):
        kw, kb = jax.random.split(k)
        bound = 1.0 / (fan_in ** 0.5)
        w = jax.random.uniform(kw, (fan_in, fan_out), jnp.float32, -bound, bound)
        b = jax.random.uniform(kb, (fan_out,), jnp.float32, -bound, bound)
        return w, b

    k = jax.random.split(key, 5)
    w_ed, b_ed = linear(k[0], 1, 10)    # ebd_data
    w_ec, b_ec = linear(k[1], 1, 10)    # ebd_condition
    w1, b1 = linear(k[2], 20, 30)       # net[0]
    w2, b2 = linear(k[3], 30, 30)       # net[2]
    w3, b3 = linear(k[4], 30, 1)        # net[4]
    return (w_ed, b_ed, w_ec, b_ec, w1, b1, w2, b2, w3, b3)


def reference_forward(x, condition, params):
    """Pure-JAX reference matching the PyTorch forward exactly."""
    (w_ed, b_ed, w_ec, b_ec, w1, b1, w2, b2, w3, b3) = params
    ex = x @ w_ed + b_ed
    ec = condition @ w_ec + b_ec
    h = jnp.concatenate([ex, ec], axis=1)
    h = h @ w1 + b1
    h = jnp.where(h > 0, h, 0.1 * h)
    h = h @ w2 + b2
    h = jnp.where(h > 0, h, 0.1 * h)
    h = h @ w3 + b3
    return jax.nn.sigmoid(h)


if __name__ == "__main__":
    key = jax.random.PRNGKey(0)
    kx, kc, kp = jax.random.split(key, 3)

    B = 8
    x = jax.random.normal(kx, (B, 1), dtype=jnp.float32)
    condition = jax.random.normal(kc, (B, 1), dtype=jnp.float32)
    params = init_params(kp)

    out = simpled_forward(x, condition, params)
    out = jax.block_until_ready(out)

    ref = reference_forward(x, condition, params)
    assert out.shape == (B, 1)
    assert jnp.allclose(out, ref, atol=1e-5, rtol=1e-5), (out, ref)

    print("KERNEL_OK")
</pallas_src>

<mosaic_0001>
module attributes {stable_mosaic.version = 11 : i64} {
  func.func @_simpled_kernel(%arg0: i32, %arg1: memref<1x128xf32, #tpu.memory_space<vmem>>, %arg2: memref<1x128xf32, #tpu.memory_space<vmem>>, %arg3: memref<10x1xf32, #tpu.memory_space<vmem>>, %arg4: memref<10x1xf32, #tpu.memory_space<vmem>>, %arg5: memref<10x1xf32, #tpu.memory_space<vmem>>, %arg6: memref<10x1xf32, #tpu.memory_space<vmem>>, %arg7: memref<30x10xf32, #tpu.memory_space<vmem>>, %arg8: memref<30x10xf32, #tpu.memory_space<vmem>>, %arg9: memref<30x1xf32, #tpu.memory_space<vmem>>, %arg10: memref<30x30xf32, #tpu.memory_space<vmem>>, %arg11: memref<30x1xf32, #tpu.memory_space<vmem>>, %arg12: memref<30x1xf32, #tpu.memory_space<vmem>>, %arg13: memref<1x1xf32, #tpu.memory_space<vmem>>, %arg14: memref<1x128xf32, #tpu.memory_space<vmem>>) attributes {dimension_semantics = [#tpu.dimension_semantics<parallel>], iteration_bounds = array<i64: 1>, scalar_prefetch = 0 : i64, scratch_operands = 0 : i64, tpu.core_type = #tpu.core_type<tc>, window_params = [{transform_indices = @transform_0, window_bounds = array<i64: 1, 128>}, {transform_indices = @transform_1, window_bounds = array<i64: 1, 128>}, {pipeline_mode = #tpu.pipeline_mode<synchronous>, transform_indices = @transform_2, window_bounds = array<i64: 10, 1>}, {pipeline_mode = #tpu.pipeline_mode<synchronous>, transform_indices = @transform_3, window_bounds = array<i64: 10, 1>}, {pipeline_mode = #tpu.pipeline_mode<synchronous>, transform_indices = @transform_4, window_bounds = array<i64: 10, 1>}, {pipeline_mode = #tpu.pipeline_mode<synchronous>, transform_indices = @transform_5, window_bounds = array<i64: 10, 1>}, {pipeline_mode = #tpu.pipeline_mode<synchronous>, transform_indices = @transform_6, window_bounds = array<i64: 30, 10>}, {pipeline_mode = #tpu.pipeline_mode<synchronous>, transform_indices = @transform_7, window_bounds = array<i64: 30, 10>}, {pipeline_mode = #tpu.pipeline_mode<synchronous>, transform_indices = @transform_8, window_bounds = array<i64: 30, 1>}, {pipeline_mode = #tpu.pipeline_mode<synchronous>, transform_indices = @transform_9, window_bounds = array<i64: 30, 30>}, {pipeline_mode = #tpu.pipeline_mode<synchronous>, transform_indices = @transform_10, window_bounds = array<i64: 30, 1>}, {pipeline_mode = #tpu.pipeline_mode<synchronous>, transform_indices = @transform_11, window_bounds = array<i64: 30, 1>}, {pipeline_mode = #tpu.pipeline_mode<synchronous>, transform_indices = @transform_12, window_bounds = array<i64: 1, 1>}, {transform_indices = @transform_13, window_bounds = array<i64: 1, 128>}]} {
    %c0 = arith.constant 0 : index
    %c0_0 = arith.constant 0 : index
    %0 = vector.load %arg1[%c0, %c0_0] : memref<1x128xf32, #tpu.memory_space<vmem>>, vector<1x128xf32>
    %c0_1 = arith.constant 0 : index
    %c0_2 = arith.constant 0 : index
    %1 = vector.load %arg2[%c0_1, %c0_2] : memref<1x128xf32, #tpu.memory_space<vmem>>, vector<1x128xf32>
    %c0_3 = arith.constant 0 : index
    %c0_4 = arith.constant 0 : index
    %2 = vector.load %arg3[%c0_3, %c0_4] : memref<10x1xf32, #tpu.memory_space<vmem>>, vector<10x1xf32>
    %3 = vector.broadcast %2 : vector<10x1xf32> to vector<10x128xf32>
    %4 = vector.broadcast %0 : vector<1x128xf32> to vector<10x128xf32>
    %5 = arith.mulf %3, %4 : vector<10x128xf32>
    %c0_5 = arith.constant 0 : index
    %c0_6 = arith.constant 0 : index
    %6 = vector.load %arg4[%c0_5, %c0_6] : memref<10x1xf32, #tpu.memory_space<vmem>>, vector<10x1xf32>
    %7 = vector.broadcast %6 : vector<10x1xf32> to vector<10x128xf32>
    %8 = arith.addf %5, %7 : vector<10x128xf32>
    %c0_7 = arith.constant 0 : index
    %c0_8 = arith.constant 0 : index
    %9 = vector.load %arg5[%c0_7, %c0_8] : memref<10x1xf32, #tpu.memory_space<vmem>>, vector<10x1xf32>
    %10 = vector.broadcast %9 : vector<10x1xf32> to vector<10x128xf32>
    %11 = vector.broadcast %1 : vector<1x128xf32> to vector<10x128xf32>
    %12 = arith.mulf %10, %11 : vector<10x128xf32>
    %c0_9 = arith.constant 0 : index
    %c0_10 = arith.constant 0 : index
    %13 = vector.load %arg6[%c0_9, %c0_10] : memref<10x1xf32, #tpu.memory_space<vmem>>, vector<10x1xf32>
    %14 = vector.broadcast %13 : vector<10x1xf32> to vector<10x128xf32>
    %15 = arith.addf %12, %14 : vector<10x128xf32>
    %c0_11 = arith.constant 0 : index
    %c0_12 = arith.constant 0 : index
    %16 = vector.load %arg7[%c0_11, %c0_12] : memref<30x10xf32, #tpu.memory_space<vmem>>, vector<30x10xf32>
    %cst = arith.constant dense<0.000000e+00> : vector<30x128xf32>
    %17 = tpu.matmul %16, %8, %cst {dimension_numbers = #tpu.dot_dimension_numbers<[1], [0], [0], [1], [0, 0, 1, 1], [], []>} : vector<30x10xf32>, vector<10x128xf32>, vector<30x128xf32> -> vector<30x128xf32>
    %c0_13 = arith.constant 0 : index
    %c0_14 = arith.constant 0 : index
    %18 = vector.load %arg8[%c0_13, %c0_14] : memref<30x10xf32, #tpu.memory_space<vmem>>, vector<30x10xf32>
    %cst_15 = arith.constant dense<0.000000e+00> : vector<30x128xf32>
    %19 = tpu.matmul %18, %15, %cst_15 {dimension_numbers = #tpu.dot_dimension_numbers<[1], [0], [0], [1], [0, 0, 1, 1], [], []>} : vector<30x10xf32>, vector<10x128xf32>, vector<30x128xf32> -> vector<30x128xf32>
    %20 = arith.addf %17, %19 : vector<30x128xf32>
    %c0_16 = arith.constant 0 : index
    %c0_17 = arith.constant 0 : index
    %21 = vector.load %arg9[%c0_16, %c0_17] : memref<30x1xf32, #tpu.memory_space<vmem>>, vector<30x1xf32>
    %22 = vector.broadcast %21 : vector<30x1xf32> to vector<30x128xf32>
    %23 = arith.addf %20, %22 : vector<30x128xf32>
    %cst_18 = arith.constant 0.000000e+00 : f32
    %24 = vector.broadcast %cst_18 : f32 to vector<30x128xf32>
    %25 = arith.cmpf ogt, %23, %24 : vector<30x128xf32>
    %cst_19 = arith.constant 1.000000e-01 : f32
    %26 = vector.broadcast %cst_19 : f32 to vector<30x128xf32>
    %27 = arith.mulf %26, %23 : vector<30x128xf32>
    %28 = arith.select %25, %23, %27 : vector<30x128xi1>, vector<30x128xf32>
    %c0_20 = arith.constant 0 : index
    %c0_21 = arith.constant 0 : index
    %29 = vector.load %arg10[%c0_20, %c0_21] : memref<30x30xf32, #tpu.memory_space<vmem>>, vector<30x30xf32>
    %cst_22 = arith.constant dense<0.000000e+00> : vector<30x128xf32>
    %30 = tpu.matmul %29, %28, %cst_22 {dimension_numbers = #tpu.dot_dimension_numbers<[1], [0], [0], [1], [0, 0, 1, 1], [], []>} : vector<30x30xf32>, vector<30x128xf32>, vector<30x128xf32> -> vector<30x128xf32>
    %c0_23 = arith.constant 0 : index
    %c0_24 = arith.constant 0 : index
    %31 = vector.load %arg11[%c0_23, %c0_24] : memref<30x1xf32, #tpu.memory_space<vmem>>, vector<30x1xf32>
    %32 = vector.broadcast %31 : vector<30x1xf32> to vector<30x128xf32>
    %33 = arith.addf %30, %32 : vector<30x128xf32>
    %cst_25 = arith.constant 0.000000e+00 : f32
    %34 = vector.broadcast %cst_25 : f32 to vector<30x128xf32>
    %35 = arith.cmpf ogt, %33, %34 : vector<30x128xf32>
    %cst_26 = arith.constant 1.000000e-01 : f32
    %36 = vector.broadcast %cst_26 : f32 to vector<30x128xf32>
    %37 = arith.mulf %36, %33 : vector<30x128xf32>
    %38 = arith.select %35, %33, %37 : vector<30x128xi1>, vector<30x128xf32>
    %c0_27 = arith.constant 0 : index
    %c0_28 = arith.constant 0 : index
    %39 = vector.load %arg12[%c0_27, %c0_28] : memref<30x1xf32, #tpu.memory_space<vmem>>, vector<30x1xf32>
    %40 = vector.broadcast %39 : vector<30x1xf32> to vector<30x128xf32>
    %41 = arith.mulf %40, %38 : vector<30x128xf32>
    %cst_29 = arith.constant dense<0.000000e+00> : vector<128xf32>
    %42 = vector.multi_reduction <add>, %41, %cst_29 [0] : vector<30x128xf32> to vector<128xf32>
    %43 = vector.shape_cast %42 : vector<128xf32> to vector<1x128xf32>
    %c0_30 = arith.constant 0 : index
    %c0_31 = arith.constant 0 : index
    %44 = vector.load %arg13[%c0_30, %c0_31] : memref<1x1xf32, #tpu.memory_space<vmem>>, vector<1x1xf32>
    %45 = vector.broadcast %44 : vector<1x1xf32> to vector<1x128xf32>
    %46 = arith.addf %43, %45 : vector<1x128xf32>
    %cst_32 = arith.constant 0.000000e+00 : f32
    %47 = vector.broadcast %cst_32 : f32 to vector<1x128xf32>
    %48 = arith.subf %47, %46 : vector<1x128xf32>
    %49 = math.exp %48 : vector<1x128xf32>
    %cst_33 = arith.constant 1.000000e+00 : f32
    %50 = vector.broadcast %cst_33 : f32 to vector<1x128xf32>
    %51 = arith.addf %50, %49 : vector<1x128xf32>
    %cst_34 = arith.constant 1.000000e+00 : f32
    %52 = vector.broadcast %cst_34 : f32 to vector<1x128xf32>
    %53 = arith.divf %52, %51 : vector<1x128xf32>
    %c0_35 = arith.constant 0 : index
    %c0_36 = arith.constant 0 : index
    %54 = vector.load %arg14[%c0_35, %c0_36] : memref<1x128xf32, #tpu.memory_space<vmem>>, vector<1x128xf32>
    tpu.vector_store %arg14[%c0_35, %c0_36], %53 {strides = array<i32>} : memref<1x128xf32, #tpu.memory_space<vmem>>, vector<1x128xf32>,
    return
  }
  func.func @transform_0(%arg0: i32) -> (i32, i32) {
    %c0_i32 = arith.constant 0 : i32
    %c0_i32_0 = arith.constant 0 : i32
    return %c0_i32, %arg0 : i32, i32
  }
  func.func @transform_1(%arg0: i32) -> (i32, i32) {
    %c0_i32 = arith.constant 0 : i32
    %c0_i32_0 = arith.constant 0 : i32
    return %c0_i32, %arg0 : i32, i32
  }
  func.func @transform_2(%arg0: i32) -> (i32, i32) {
    %c0_i32 = arith.constant 0 : i32
    %c0_i32_0 = arith.constant 0 : i32
    %c0_i32_1 = arith.constant 0 : i32
    return %c0_i32, %c0_i32_0 : i32, i32
  }
  func.func @transform_3(%arg0: i32) -> (i32, i32) {
    %c0_i32 = arith.constant 0 : i32
    %c0_i32_0 = arith.constant 0 : i32
    %c0_i32_1 = arith.constant 0 : i32
    return %c0_i32, %c0_i32_0 : i32, i32
  }
  func.func @transform_4(%arg0: i32) -> (i32, i32) {
    %c0_i32 = arith.constant 0 : i32
    %c0_i32_0 = arith.constant 0 : i32
    %c0_i32_1 = arith.constant 0 : i32
    return %c0_i32, %c0_i32_0 : i32, i32
  }
  func.func @transform_5(%arg0: i32) -> (i32, i32) {
    %c0_i32 = arith.constant 0 : i32
    %c0_i32_0 = arith.constant 0 : i32
    %c0_i32_1 = arith.constant 0 : i32
    return %c0_i32, %c0_i32_0 : i32, i32
  }
  func.func @transform_6(%arg0: i32) -> (i32, i32) {
    %c0_i32 = arith.constant 0 : i32
    %c0_i32_0 = arith.constant 0 : i32
    %c0_i32_1 = arith.constant 0 : i32
    return %c0_i32, %c0_i32_0 : i32, i32
  }
  func.func @transform_7(%arg0: i32) -> (i32, i32) {
    %c0_i32 = arith.constant 0 : i32
    %c0_i32_0 = arith.constant 0 : i32
    %c0_i32_1 = arith.constant 0 : i32
    return %c0_i32, %c0_i32_0 : i32, i32
  }
  func.func @transform_8(%arg0: i32) -> (i32, i32) {
    %c0_i32 = arith.constant 0 : i32
    %c0_i32_0 = arith.constant 0 : i32
    %c0_i32_1 = arith.constant 0 : i32
    return %c0_i32, %c0_i32_0 : i32, i32
  }
  func.func @transform_9(%arg0: i32) -> (i32, i32) {
    %c0_i32 = arith.constant 0 : i32
    %c0_i32_0 = arith.constant 0 : i32
    %c0_i32_1 = arith.constant 0 : i32
    return %c0_i32, %c0_i32_0 : i32, i32
  }
  func.func @transform_10(%arg0: i32) -> (i32, i32) {
    %c0_i32 = arith.constant 0 : i32
    %c0_i32_0 = arith.constant 0 : i32
    %c0_i32_1 = arith.constant 0 : i32
    return %c0_i32, %c0_i32_0 : i32, i32
  }
  func.func @transform_11(%arg0: i32) -> (i32, i32) {
    %c0_i32 = arith.constant 0 : i32
    %c0_i32_0 = arith.constant 0 : i32
    %c0_i32_1 = arith.constant 0 : i32
    return %c0_i32, %c0_i32_0 : i32, i32
  }
  func.func @transform_12(%arg0: i32) -> (i32, i32) {
    %c0_i32 = arith.constant 0 : i32
    %c0_i32_0 = arith.constant 0 : i32
    %c0_i32_1 = arith.constant 0 : i32
    return %c0_i32, %c0_i32_0 : i32, i32
  }
  func.func @transform_13(%arg0: i32) -> (i32, i32) {
    %c0_i32 = arith.constant 0 : i32
    %c0_i32_0 = arith.constant 0 : i32
    return %c0_i32, %arg0 : i32, i32
  }
}

</mosaic_0001>

<bundles_post_ra>
// kernel: tpu_custom_call.1
= control target key start
LH: loop header
LB: loop body
LE: loop exit
PB: predicated region body
PF: predicated region fallthrough
CT: control target
= control target key end

     0   :  { %s927_s0 = inlined_call_operand.vmem [shape: f32[1,128], index: 0, kind: input, shape index: {}]   ;;  %s928_s1 = inlined_call_operand.vmem [shape: f32[1,128], index: 1, kind: input, shape index: {}]   ;;  %s929_s2 = inlined_call_operand.vmem [shape: f32[10,1], index: 2, kind: input, shape index: {}]   ;;  %s930_s3 = inlined_call_operand.vmem [shape: f32[10,1], index: 3, kind: input, shape index: {}]   ;;  %s931_s4 = inlined_call_operand.vmem [shape: f32[10,1], index: 4, kind: input, shape index: {}]   ;;  %s932_s5 = inlined_call_operand.vmem [shape: f32[10,1], index: 5, kind: input, shape index: {}]   ;;  %s933_s6 = inlined_call_operand.vmem [shape: f32[30,10], index: 6, kind: input, shape index: {}]   ;;  %s934_s7 = inlined_call_operand.vmem [shape: f32[30,10], index: 7, kind: input, shape index: {}]   ;;  %s935_s8 = inlined_call_operand.vmem [shape: f32[30,1], index: 8, kind: input, shape index: {}]   ;;  %s936_s9 = inlined_call_operand.vmem [shape: f32[30,30], index: 9, kind: input, shape index: {}]   ;;  %s937_s10 = inlined_call_operand.vmem [shape: f32[30,1], index: 10, kind: input, shape index: {}]   ;;  %s938_s11 = inlined_call_operand.vmem [shape: f32[30,1], index: 11, kind: input, shape index: {}]   ;;  %s939_s12 = inlined_call_operand.<no memory space> [shape: f32[1,1], index: 12, kind: input, shape index: {}]   ;;  %s940_s13 = inlined_call_operand.hbm [shape: f32[1,128], index: 13, kind: output, shape index: {}]  }
   0x1   :  { %v18_v0 = vstv %s939_s12 }
   0x2   :  { %19 = vst [vmem:[#allocation2] sm:$0x1] %v18_v0 }
   0x3   :  { %v103_v1 = vld [vmem:[%s932_s5] sm:$0xff]  ;;  %v709_v3 = vmov 0   ;;  %v104_v4 = vld [vmem:[%s932_s5 + $0x8] sm:$0x3] }
   0x4   :  { %v83_v2 = vld [vmem:[%s931_s4] sm:$0xff]  ;;  %680 = vset.pattern.permute.xlu1 %v709_v3  ;;  %679 = vset.pattern.permute.xlu0 %v709_v3  ;;  %v84_v5 = vld [vmem:[%s931_s4 + $0x8] sm:$0x3] }
   0x5   :  { %107 = vperm.xlu1 %680, %v103_v1   ;;  %87 = vperm.xlu0 %679, %v83_v2   ;;  %v50_v6 = vld [vmem:[%s929_s2 + $0x8] sm:$0x3]  ;;  %v49_v7 = vld [vmem:[%s929_s2] sm:$0xff] }
   0x9   :  { %112 = vperm.xlu1 %680, %v104_v4   ;;  %92 = vperm.xlu0 %679, %v84_v5  }
   0xa   :  { %20 = vsyncpa [#allocation4], 0  ;;  %v70_v8 = vld [vmem:[%s930_s3 + $0x8] sm:$0x3]  ;;  %v69_v9 = vld [vmem:[%s930_s3] sm:$0xff]  ;;  %vm125_vm0 = vcmask 80896  }
   0xb   :  { %v121_v10 = vld [vmem:[%s934_s7] sm:$0xff]  ;;  %v328_v11 = vld [vmem:[%s935_s8 + $0x8] sm:$0xff]  ;;  %v330_v13 = vld [vmem:[%s935_s8 + $0x18] sm:$0x3f]  ;;  %vm138_vm1 = vcmask 1041408   ;;  %vm710_vm2 = vmmov 1  }
   0xc   :  { %v327_v12 = vld [vmem:[%s935_s8] sm:$0xff]  ;;  %620 = vmatprep.mubr.msk.f32.mxu0 %vm125_vm0, %v121_v10  ;;  %v329_v14 = vld [vmem:[%s935_s8 + $0x10] sm:$0xff]  ;;  %v372_v15 = vld [vmem:[%s937_s10 + $0x8] sm:$0xff]  ;;  %vm395_vm4 = vcmask 244736   ;;  %vm408_vm8 = vcmask 1045504  }
   0xd   :  { %58 = vperm.xlu1 %680, %v50_v6   ;;  %53 = vperm.xlu0 %679, %v49_v7   ;;  %v371_v16 = vld [vmem:[%s937_s10] sm:$0xff]  ;;  %v374_v17 = vld [vmem:[%s937_s10 + $0x18] sm:$0x3f]  ;;  %v373_v18 = vld [vmem:[%s937_s10 + $0x10] sm:$0xff] }
   0xe   :  { %v510_v19 = vld [vmem:[%s938_s11 + $0x8] sm:$0xff]  ;;  %v509_v20 = vld [vmem:[%s938_s11] sm:$0xff]  ;;  %v512_v21 = vld [vmem:[%s938_s11 + $0x18] sm:$0x3f] }
   0xf   :  { %v511_v22 = vld [vmem:[%s938_s11 + $0x10] sm:$0xff]  ;;  %v547_v23 = vld [vmem:[#allocation2] sm:$0x1]  ;;  %vm856_vm3 = vmpackc.low %vm138_vm1, %vm710_vm2 }
  0x10   :  { %v580_v26 = vld [vmem:[%s928_s1] ss:$0 sm:$0xff]  ;;  %v122_v42 = vld [vmem:[%s934_s7 + $0x8] sm:$0xff]  ;;  %v123_v45 = vld [vmem:[%s934_s7 + $0x10] sm:$0xff] }
  0x11   :  { %78 = vperm.xlu1 %680, %v70_v8   ;;  %73 = vperm.xlu0 %679, %v69_v9   ;;  %v579_v34 = vld [vmem:[%s927_s0] ss:$0 sm:$0xff]  ;;  %v124_v47 = vld [vmem:[%s934_s7 + $0x18] sm:$0x3f]  ;;  %v118_v49 = vld [vmem:[%s933_s6 + $0x8] sm:$0xff] }
  0x12   :  { %v117_v48 = vld [vmem:[%s933_s6] sm:$0xff]  ;;  %v119_v50 = vld [vmem:[%s933_s6 + $0x10] sm:$0xff]  ;;  %v120_v51 = vld [vmem:[%s933_s6 + $0x18] sm:$0x3f] }
  0x13   :  { %v367_v52 = vld [vmem:[%s936_s9] sm:$0xff]  ;;  %vm667_vm10 = vmpackc.low %vm408_vm8, %vm710_vm2 }
  0x14   :  { %644 = vmatprep.mubr.msk.f32.mxu1 %vm395_vm4, %v367_v52 }
  0x15   :  { %338 = vperm.xlu1 %680, %v328_v11   ;;  %333 = vperm.xlu0 %679, %v327_v12   ;;  %v368_v11 = vld [vmem:[%s936_s9 + $0x8] sm:$0xff]  ;;  %v369_v12 = vld [vmem:[%s936_s9 + $0x10] sm:$0xff] }
  0x19   :  { %348 = vperm.xlu1 %680, %v330_v13   ;;  %343 = vperm.xlu0 %679, %v329_v14   ;;  %v370_v13 = vld [vmem:[%s936_s9 + $0x18] sm:$0x3f]  ;;  %s711_s9 = smov [#allocation3]  }
  0x1a   :  { %s571_s4 = sshll.u32 %s711_s9, 4  ;;  %s572_s4 = int_to_ptr.vmem [resolvable:$true] %s571_s4 }
  0x1b   :  { %s685_s24 = scalar_lea.vmem %s572_s4, 16  ;;  %s689_s25 = scalar_lea.vmem %s572_s4, 32 }
  0x1c   :  { %p686_p0 = scmp.ne.s32.totalorder %s572_s4, %s685_s24  ;;  %p690_p1 = scmp.lt.s32.totalorder %s572_s4, %s572_s4 }
  0x1d   :  { %382 = vperm.xlu1 %680, %v372_v15   ;;  %377 = vperm.xlu0 %679, %v371_v16   ;;  %p691_p2 = scmp.lt.s32.totalorder %s689_s25, %s685_s24 }
  0x1f   :  { %p692_p3 = por %p691_p2, %p690_p1 }
  0x21   :  { %392 = vperm.xlu1 %680, %v374_v17   ;;  %387 = vperm.xlu0 %679, %v373_v18   ;;  %p693_p4 = pnand %p692_p3, %p686_p0 }
  0x25   :  { %520 = vperm.xlu1 %680, %v510_v19   ;;  %515 = vperm.xlu0 %679, %v509_v20  }
  0x29   :  { %530 = vperm.xlu1 %680, %v512_v21   ;;  %525 = vperm.xlu0 %679, %v511_v22  }
  0x2d   :  { %550 = vperm.xlu0 %679, %v547_v23  }
  0x84   :  { %v108_v24 = vpop.permute.xlu1 %107  ;;  %v88_v25 = vpop.permute.xlu0 %87 }
  0x85   :  { %v101_v27 = vmul.f32 %v580_v26, %v88_v25 }
  0x87   :  { %v115_v31 = vadd.f32 %v108_v24, %v101_v27 }
  0x88   :  { %v113_v28 = vpop.permute.xlu1 %112  ;;  %v93_v29 = vpop.permute.xlu0 %92 }
  0x89   :  { %v102_v30 = vmul.f32 %v580_v26, %v93_v29 }
  0x8b   :  { %v116_v32 = vadd.f32 %v113_v28, %v102_v30 }
  0x8c   :  { %v59_v33 = vpop.permute.xlu1 %58  ;;  %v54_v35 = vpop.permute.xlu0 %53 }
  0x8d   :  { %v650_v37 = vpack.c.bf16 %v116_v32, %v115_v31  ;;  %v68_v38 = vmul.f32 %v579_v34, %v59_v33  ;;  %v67_v39 = vmul.f32 %v579_v34, %v54_v35 }
  0x8f   :  { %652 = vmatprep.subr.msk.bf16.mxu0 %vm856_vm3, %v650_v37 }
  0x90   :  { %v79_v40 = vpop.permute.xlu1 %78  ;;  %v74_v41 = vpop.permute.xlu0 %73  ;;  %655 = vmatpush3.bf16.msk.msra.mxu0 %vm856_vm3, %v650_v37 }
  0x91   :  { %v82_v43 = vadd.f32 %v79_v40, %v68_v38  ;;  %v81_v44 = vadd.f32 %v74_v41, %v67_v39 }
  0x93   :  { %v656_v46 = vpack.c.bf16 %v82_v43, %v81_v44  ;;  %621 = vmatmul.mubr.msk.f32.vlgmr.msra.gmra.mrb[0].mxu0 %vm125_vm0, %v122_v42 }
  0x94   :  { %623 = vmatprep.mubr.msk.f32.mxu0 %vm125_vm0, %v123_v45  ;;  %v339_v53 = vpop.permute.xlu1 %338  ;;  %v334_v54 = vpop.permute.xlu0 %333  ;;  %v553_v45 = vlaneseq }
  0x95   :  { %658 = vmatprep.subr.msk.bf16.mxu0 %vm856_vm3, %v656_v46 }
  0x96   :  { %661 = vmatpush3.bf16.msk.msra.mxu0 %vm856_vm3, %v656_v46 }
  0x97   :  { %624 = vmatmul.mubr.msk.f32.gmra.mrb[2].mxu0 %vm125_vm0, %v124_v47 }
  0x98   :  { %630 = vmatprep.mubr.msk.f32.mxu0 %vm125_vm0, %v117_v48  ;;  %v349_v60 = vpop.permute.xlu1 %348  ;;  %v344_v63 = vpop.permute.xlu0 %343  ;;  %v554_v48 = vshrl.u32 %v553_v45, 7 }
  0x9b   :  { %631 = vmatmul.mubr.msk.f32.vlgmr.msra.gmra.mrb[0].mxu0 %vm125_vm0, %v118_v49 }
  0x9c   :  { %633 = vmatprep.mubr.msk.f32.mxu0 %vm125_vm0, %v119_v50  ;;  %v383_v14 = vpop.permute.xlu1 %382  ;;  %v378_v15 = vpop.permute.xlu0 %377 }
  0x9f   :  { %634 = vmatmul.mubr.msk.f32.gmra.mrb[2].mxu0 %vm125_vm0, %v120_v51  ;;  %v555_v51 = vsub.s32 0, %v554_v48 }
  0xa0   :  { %v393_v16 = vpop.permute.xlu1 %392  ;;  %v388_v17 = vpop.permute.xlu0 %387 }
  0xa4   :  { %v521_v22 = vpop.permute.xlu1 %520  ;;  %v516_v24 = vpop.permute.xlu0 %515 }
  0xa8   :  { %v531_v36 = vpop.permute.xlu1 %530  ;;  %v526_v39 = vpop.permute.xlu0 %525 }
 0x16e   :  { %v632_v55 = vpop.f32.mrb[0].mxu0 }
 0x16f   :  { %v352_v56 = vadd.f32 %v632_v55, %v339_v53  ;;  %v308_v57 = vpop.f32.mrb[1].mxu0  ;;  %v551_v53 = vpop.permute.xlu0 %550 }
 0x170   :  { %v351_v58 = vadd.f32 %v334_v54, %v308_v57  ;;  %v556_v55 = vrot.slane %v551_v53, %v555_v51 }
 0x171   :  { %v360_v59 = vmul.f32 0.1, %v352_v56  ;;  %vm356_vm5 = vcmp.gt.f32.partialorder %v352_v56, 0.0 }
 0x172   :  { %v359_v61 = vmul.f32 0.1, %v351_v58  ;;  %v635_v62 = vpop.f32.mrb[2].mxu0  ;;  %vm355_vm6 = vcmp.gt.f32.partialorder %v351_v58, 0.0 }
 0x173   :  { %v354_v0 = vadd.f32 %v635_v62, %v349_v60  ;;  %v318_v1 = vpop.f32.mrb[3].mxu0  ;;  %v364_v2 = vsel %vm356_vm5, %v352_v56, %v360_v59 }
 0x174   :  { %v353_v3 = vadd.f32 %v344_v63, %v318_v1  ;;  %v363_v4 = vsel %vm355_vm6, %v351_v58, %v359_v61 }
 0x175   :  { %vm358_vm7 = vcmp.gt.f32.partialorder %v354_v0, 0.0  ;;  %v362_v5 = vmul.f32 0.1, %v354_v0  ;;  %v662_v6 = vpack.c.bf16 %v364_v2, %v363_v4 }
 0x176   :  { %vm357_vm9 = vcmp.gt.f32.partialorder %v353_v3, 0.0  ;;  %v361_v7 = vmul.f32 0.1, %v353_v3 }
 0x177   :  { %v366_v8 = vsel %vm358_vm7, %v354_v0, %v362_v5  ;;  %663 = vmatprep.subr.bf16.mxu1 %v662_v6 }
 0x178   :  { %v365_v9 = vsel %vm357_vm9, %v353_v3, %v361_v7  ;;  %665 = vmatpush3.bf16.msra.mxu1 %v662_v6 }
 0x179   :  { %v666_v10 = vpack.c.bf16 %v366_v8, %v365_v9 }
 0x17b   :  { %668 = vmatprep.subr.msk.bf16.mxu1 %vm667_vm10, %v666_v10 }
 0x17c   :  { %671 = vmatpush3.bf16.msk.msra.mxu1 %vm667_vm10, %v666_v10 }
 0x17f   :  { %645 = vmatmul.mubr.msk.f32.vlgmr.msra.gmra.mrb[0].mxu1 %vm395_vm4, %v368_v11 }
 0x180   :  { %647 = vmatprep.mubr.msk.f32.mxu1 %vm395_vm4, %v369_v12 }
 0x183   :  { %648 = vmatmul.mubr.msk.f32.gmra.mrb[2].mxu1 %vm395_vm4, %v370_v13 }
 0x252   :  { %v646_v18 = vpop.f32.mrb[0].mxu1 }
 0x253   :  { %v484_v19 = vadd.f32 %v646_v18, %v383_v14  ;;  %v478_v20 = vpop.f32.mrb[1].mxu1 }
 0x254   :  { %v479_v21 = vadd.f32 %v478_v20, %v378_v15 }
 0x255   :  { %vm498_vm11 = vcmp.gt.f32.partialorder %v484_v19, 0.0  ;;  %v502_v23 = vmul.f32 0.1, %v484_v19 }
 0x256   :  { %vm497_vm12 = vcmp.gt.f32.partialorder %v479_v21, 0.0  ;;  %v501_v25 = vmul.f32 0.1, %v479_v21  ;;  %v649_v26 = vpop.f32.mrb[2].mxu1 }
 0x257   :  { %v506_v27 = vsel %vm498_vm11, %v484_v19, %v502_v23  ;;  %v494_v28 = vadd.f32 %v649_v26, %v393_v16  ;;  %v488_v29 = vpop.f32.mrb[3].mxu1 }
 0x258   :  { %v534_v30 = vmul.f32 %v521_v22, %v506_v27  ;;  %v505_v31 = vsel %vm497_vm12, %v479_v21, %v501_v25  ;;  %v489_v32 = vadd.f32 %v488_v29, %v388_v17 }
 0x259   :  { %v533_v33 = vmul.f32 %v516_v24, %v505_v31  ;;  %vm500_vm13 = vcmp.gt.f32.partialorder %v494_v28, 0.0  ;;  %v504_v34 = vmul.f32 0.1, %v494_v28 }
 0x25a   :  { %vm499_vm14 = vcmp.gt.f32.partialorder %v489_v32, 0.0  ;;  %v503_v35 = vmul.f32 0.1, %v489_v32 }
 0x25b   :  { %v537_v37 = vadd.f32 %v534_v30, %v533_v33  ;;  %v508_v38 = vsel %vm500_vm13, %v494_v28, %v504_v34 }
 0x25c   :  { %v536_v40 = vmul.f32 %v531_v36, %v508_v38  ;;  %v507_v41 = vsel %vm499_vm14, %v489_v32, %v503_v35 }
 0x25d   :  { %v535_v42 = vmul.f32 %v526_v39, %v507_v41 }
 0x25e   :  { %v539_v44 = vsel %vm408_vm8, %v536_v40, 0.0 }
 0x25f   :  { %v538_v43 = vadd.f32 %v537_v37, %v535_v42 }
 0x261   :  { %v540_v46 = vadd.f32 %v539_v44, %v538_v43 }
 0x263   :  { %v541_v47 = vrot.slane %v540_v46, 4 }
 0x265   :  { %v542_v49 = vadd.f32 %v541_v47, %v540_v46 }
 0x267   :  { %v543_v50 = vrot.slane %v542_v49, 2 }
 0x269   :  { %v544_v52 = vadd.f32 %v543_v50, %v542_v49 }
 0x26b   :  { %v545_v54 = vrot.slane %v544_v52, 1 }
 0x26d   :  { %v546_v56 = vadd.f32 %v545_v54, %v544_v52 }
 0x26f   :  { %v557_v57 = vadd.f32 %v556_v55, %v546_v56 }
 0x271   :  { %v558_v58 = vsub.f32 0.0, %v557_v57 }
 0x273   :  { %v559_v59 = vmul.f32 1.442695, %v558_v58 }
 0x275   :  { %681 = vpow2.f32 %v559_v59 }
 0x27f   :  { %v682_v60 = vpop.eup %681 }
 0x280   :  { %v561_v61 = vadd.f32 1.0, %v682_v60 }
 0x282   :  { %683 = vrcp.f32 %v561_v61 }
 0x28c   :  { %v684_v62 = vpop.eup %683 }
 0x28d   :  { %564 = vst [vmem:[#allocation3] sm:$0x1] %v684_v62 }
 0x28e   :  { %696 = shalt.err (!%p693_p4)
}
 0x28f   :  { %s697_s26 = scalar_lea.hbm %s940_s13, 16 }
 0x290   :  { %p698_p5 = scmp.ne.s32.totalorder %s940_s13, %s697_s26  ;;  %p701_p6 = scmp.lt.u32.totalorder %s697_s26, %s940_s13 }
 0x292   :  { %p703_p7 = pnand %p701_p6, %p698_p5 }
 0x294   :  { %706 = shalt.err (!%p703_p7)
}
 0x295   :  { %574 = dma.vmem_to_hbm [thread:$0]  %s572_s4, 16, %s940_s13, [#allocation4]  }
 0x296   :  { %707 = dma.done.wait [#allocation4], 16  }
 0x297   :  { %708 = vsyncadd [#allocation4], 4294967280 }
 0x298   :  { %578 = vsyncpa [#allocation4], 1 }

</bundles_post_ra>
